<compile_context>
chip_gen: v7x
topology: tpu7x:2x2x1
jax: 0.10.0
libtpu: 0.0.40
codegen_flags: <defaults>
</compile_context>

<pallas_src>
import functools

import jax
import jax.numpy as jnp
from jax.experimental import pallas as pl
from jax.experimental.pallas import tpu as pltpu

_EPS = 1e-6


def _canny_kernel(pred_ref, targ_ref, out_ref, *, weights):
    # pred_ref / targ_ref: (1, C_used, H, W) f32 VMEM blocks (one image each)
    # out_ref:             (1, 1, 128) f32 VMEM block (partial sum in lane 0)
    _, _, H, W = pred_ref.shape

    def to_gray(ref):
        g = weights[0] * ref[0, 0, :, :]
        for c in range(1, len(weights)):
            g = g + weights[c] * ref[0, c, :, :]
        return g  # (H, W) f32

    p = to_gray(pred_ref)
    t = to_gray(targ_ref)

    def hv(g):
        gl = g[:, :-2]    # g[:, j-1] for interior j    (H, W-2)
        gc = g[:, 1:-1]   # g[:, j]
        gr = g[:, 2:]     # g[:, j+1]
        h = gr - gl                   # horizontal difference (Sobel-x inner)
        v = gl + 2.0 * gc + gr        # horizontal smoothing  (Sobel-y inner)
        return h, v

    hp, vp = hv(p)
    ht, vt = hv(t)

    def edge(gx, gy):
        return jnp.sqrt(gx * gx + gy * gy + _EPS)

    # --- A: interior rows x interior cols --------------------------------
    def interior(h, v):
        gx = h[:-2] + 2.0 * h[1:-1] + h[2:]   # sublane-axis shifts (cheap)
        gy = v[2:] - v[:-2]
        return edge(gx, gy)

    total = jnp.sum(jnp.abs(interior(hp, vp) - interior(ht, vt)))

    # --- B: top / bottom rows, interior cols (reflect => gy == 0) --------
    def top(h):
        return edge(2.0 * (h[0:1, :] + h[1:2, :]), 0.0)

    def bot(h):
        return edge(2.0 * (h[H - 1:H, :] + h[H - 2:H - 1, :]), 0.0)

    total += jnp.sum(jnp.abs(top(hp) - top(ht)))
    total += jnp.sum(jnp.abs(bot(hp) - bot(ht)))

    # --- C: left / right cols, interior rows (reflect => gx == 0) --------
    def col_v(g, j0, j1):                       # smoothing at a boundary col (H, 1)
        return 2.0 * (g[:, j0:j0 + 1] + g[:, j1:j1 + 1])

    def col_edge(v):                            # interior rows only (H-2, 1)
        return edge(0.0, v[2:] - v[:-2])

    total += jnp.sum(jnp.abs(col_edge(col_v(p, 0, 1)) - col_edge(col_v(t, 0, 1))))
    total += jnp.sum(jnp.abs(col_edge(col_v(p, W - 1, W - 2))
                             - col_edge(col_v(t, W - 1, W - 2))))

    # --- D: 4 corners: gx == gy == 0 for both images -> |diff| == 0 (skip).

    lane = jax.lax.broadcasted_iota(jnp.int32, (1, 1, 128), 2)
    out_ref[...] = jnp.where(lane == 0, total, 0.0).astype(jnp.float32)


def canny_loss(pred, target, grayscale=True):
    """pred, target: (N, C, H, W). Returns scalar L1 loss between Sobel edge maps."""
    pred = pred.astype(jnp.float32)
    target = target.astype(jnp.float32)
    N, C, H, W = pred.shape
    assert H >= 3 and W >= 3, "CannyLoss kernel requires H >= 3 and W >= 3"

    if grayscale and C >= 3:
        weights = (0.299, 0.587, 0.114)     # Y = 0.299 R + 0.587 G + 0.114 B
    else:
        assert C == 1, "non-grayscale path requires C == 1"
        weights = (1.0,)
    c_used = len(weights)                   # only DMA the channels actually used

    kernel = functools.partial(_canny_kernel, weights=weights)
    in_spec = pl.BlockSpec((1, c_used, H, W), lambda n: (n, 0, 0, 0))

    partials = pl.pallas_call(
        kernel,
        out_shape=jax.ShapeDtypeStruct((N, 1, 128), jnp.float32),
        grid=(N,),
        in_specs=[in_spec, in_spec],
        out_specs=pl.BlockSpec((1, 1, 128), lambda n: (n, 0, 0)),
        compiler_params=pltpu.CompilerParams(
            dimension_semantics=("parallel",),
            vmem_limit_bytes=64 * 1024 * 1024,
        ),
    )(pred, target)

    return jnp.sum(partials) / jnp.float32(N * H * W)


def _canny_loss_ref(pred, target, grayscale=True):
    """Pure-JAX reference for correctness checking (mirrors the PyTorch module)."""
    pred = pred.astype(jnp.float32)
    target = target.astype(jnp.float32)
    if grayscale and pred.shape[1] >= 3:
        pred_g = 0.299 * pred[:, 0] + 0.587 * pred[:, 1] + 0.114 * pred[:, 2]
        targ_g = 0.299 * target[:, 0] + 0.587 * target[:, 1] + 0.114 * target[:, 2]
    else:
        pred_g, targ_g = pred[:, 0], target[:, 0]

    sobel_x = jnp.array([[-1.0, 0.0, 1.0], [-2.0, 0.0, 2.0], [-1.0, 0.0, 1.0]], jnp.float32)
    sobel_y = jnp.array([[-1.0, -2.0, -1.0], [0.0, 0.0, 0.0], [1.0, 2.0, 1.0]], jnp.float32)

    def conv(x, w):
        xp = jnp.pad(x, ((0, 0), (1, 1), (1, 1)), mode="reflect")
        out = jnp.zeros_like(x)
        H, W = x.shape[1], x.shape[2]
        for di in range(3):
            for dj in range(3):
                out = out + w[di, dj] * xp[:, di:di + H, dj:dj + W]
        return out

    pe = jnp.sqrt(conv(pred_g, sobel_x) ** 2 + conv(pred_g, sobel_y) ** 2 + 1e-6)
    te = jnp.sqrt(conv(targ_g, sobel_x) ** 2 + conv(targ_g, sobel_y) ** 2 + 1e-6)
    return jnp.mean(jnp.abs(pe - te))


if __name__ == "__main__":
    key = jax.random.PRNGKey(0)
    k1, k2 = jax.random.split(key)
    N, C, H, W = 2, 4, 16, 16
    pred = jax.random.uniform(k1, (N, C, H, W), dtype=jnp.float32)
    target = jax.random.uniform(k2, (N, C, H, W), dtype=jnp.float32)

    loss = jax.jit(canny_loss)(pred, target)
    jax.block_until_ready(loss)

    ref = _canny_loss_ref(pred, target)
    jax.block_until_ready(ref)
    assert jnp.allclose(loss, ref, rtol=1e-4, atol=1e-5), (loss, ref)

    print("KERNEL_OK")
</pallas_src>

<mosaic_0001>
module attributes {stable_mosaic.version = 11 : i64} {
  func.func @_canny_kernel(%arg0: i32, %arg1: memref<1x3x16x16xf32, #tpu.memory_space<vmem>>, %arg2: memref<1x3x16x16xf32, #tpu.memory_space<vmem>>, %arg3: memref<1x1x128xf32, #tpu.memory_space<vmem>>) attributes {dimension_semantics = [#tpu.dimension_semantics<parallel>], iteration_bounds = array<i64: 2>, scalar_prefetch = 0 : i64, scratch_operands = 0 : i64, tpu.core_type = #tpu.core_type<tc>, window_params = [{transform_indices = @transform_0, window_bounds = array<i64: 1, 3, 16, 16>}, {transform_indices = @transform_1, window_bounds = array<i64: 1, 3, 16, 16>}, {transform_indices = @transform_2, window_bounds = array<i64: 1, 1, 128>}]} {
    %c0 = arith.constant 0 : index
    %c0_0 = arith.constant 0 : index
    %c0_1 = arith.constant 0 : index
    %c0_2 = arith.constant 0 : index
    %0 = vector.load %arg1[%c0, %c0_0, %c0_1, %c0_2] : memref<1x3x16x16xf32, #tpu.memory_space<vmem>>, vector<1x1x16x16xf32>
    %1 = vector.shape_cast %0 : vector<1x1x16x16xf32> to vector<16x16xf32>
    %cst = arith.constant 2.990000e-01 : f32
    %2 = vector.broadcast %cst : f32 to vector<16x16xf32>
    %3 = arith.mulf %2, %1 : vector<16x16xf32>
    %c0_3 = arith.constant 0 : index
    %c1 = arith.constant 1 : index
    %c0_4 = arith.constant 0 : index
    %c0_5 = arith.constant 0 : index
    %4 = vector.load %arg1[%c0_3, %c1, %c0_4, %c0_5] : memref<1x3x16x16xf32, #tpu.memory_space<vmem>>, vector<1x1x16x16xf32>
    %5 = vector.shape_cast %4 : vector<1x1x16x16xf32> to vector<16x16xf32>
    %cst_6 = arith.constant 5.870000e-01 : f32
    %6 = vector.broadcast %cst_6 : f32 to vector<16x16xf32>
    %7 = arith.mulf %6, %5 : vector<16x16xf32>
    %8 = arith.addf %3, %7 : vector<16x16xf32>
    %c0_7 = arith.constant 0 : index
    %c2 = arith.constant 2 : index
    %c0_8 = arith.constant 0 : index
    %c0_9 = arith.constant 0 : index
    %9 = vector.load %arg1[%c0_7, %c2, %c0_8, %c0_9] : memref<1x3x16x16xf32, #tpu.memory_space<vmem>>, vector<1x1x16x16xf32>
    %10 = vector.shape_cast %9 : vector<1x1x16x16xf32> to vector<16x16xf32>
    %cst_10 = arith.constant 1.140000e-01 : f32
    %11 = vector.broadcast %cst_10 : f32 to vector<16x16xf32>
    %12 = arith.mulf %11, %10 : vector<16x16xf32>
    %13 = arith.addf %8, %12 : vector<16x16xf32>
    %c0_11 = arith.constant 0 : index
    %c0_12 = arith.constant 0 : index
    %c0_13 = arith.constant 0 : index
    %c0_14 = arith.constant 0 : index
    %14 = vector.load %arg2[%c0_11, %c0_12, %c0_13, %c0_14] : memref<1x3x16x16xf32, #tpu.memory_space<vmem>>, vector<1x1x16x16xf32>
    %15 = vector.shape_cast %14 : vector<1x1x16x16xf32> to vector<16x16xf32>
    %cst_15 = arith.constant 2.990000e-01 : f32
    %16 = vector.broadcast %cst_15 : f32 to vector<16x16xf32>
    %17 = arith.mulf %16, %15 : vector<16x16xf32>
    %c0_16 = arith.constant 0 : index
    %c1_17 = arith.constant 1 : index
    %c0_18 = arith.constant 0 : index
    %c0_19 = arith.constant 0 : index
    %18 = vector.load %arg2[%c0_16, %c1_17, %c0_18, %c0_19] : memref<1x3x16x16xf32, #tpu.memory_space<vmem>>, vector<1x1x16x16xf32>
    %19 = vector.shape_cast %18 : vector<1x1x16x16xf32> to vector<16x16xf32>
    %cst_20 = arith.constant 5.870000e-01 : f32
    %20 = vector.broadcast %cst_20 : f32 to vector<16x16xf32>
    %21 = arith.mulf %20, %19 : vector<16x16xf32>
    %22 = arith.addf %17, %21 : vector<16x16xf32>
    %c0_21 = arith.constant 0 : index
    %c2_22 = arith.constant 2 : index
    %c0_23 = arith.constant 0 : index
    %c0_24 = arith.constant 0 : index
    %23 = vector.load %arg2[%c0_21, %c2_22, %c0_23, %c0_24] : memref<1x3x16x16xf32, #tpu.memory_space<vmem>>, vector<1x1x16x16xf32>
    %24 = vector.shape_cast %23 : vector<1x1x16x16xf32> to vector<16x16xf32>
    %cst_25 = arith.constant 1.140000e-01 : f32
    %25 = vector.broadcast %cst_25 : f32 to vector<16x16xf32>
    %26 = arith.mulf %25, %24 : vector<16x16xf32>
    %27 = arith.addf %22, %26 : vector<16x16xf32>
    %28 = vector.extract_strided_slice %13 {offsets = [0, 0], sizes = [16, 14], strides = [1, 1]} : vector<16x16xf32> to vector<16x14xf32>
    %29 = vector.extract_strided_slice %13 {offsets = [0, 1], sizes = [16, 14], strides = [1, 1]} : vector<16x16xf32> to vector<16x14xf32>
    %30 = vector.extract_strided_slice %13 {offsets = [0, 2], sizes = [16, 14], strides = [1, 1]} : vector<16x16xf32> to vector<16x14xf32>
    %31 = arith.subf %30, %28 : vector<16x14xf32>
    %cst_26 = arith.constant 2.000000e+00 : f32
    %32 = vector.broadcast %cst_26 : f32 to vector<16x14xf32>
    %33 = arith.mulf %32, %29 : vector<16x14xf32>
    %34 = arith.addf %28, %33 : vector<16x14xf32>
    %35 = arith.addf %34, %30 : vector<16x14xf32>
    %36 = vector.extract_strided_slice %27 {offsets = [0, 0], sizes = [16, 14], strides = [1, 1]} : vector<16x16xf32> to vector<16x14xf32>
    %37 = vector.extract_strided_slice %27 {offsets = [0, 1], sizes = [16, 14], strides = [1, 1]} : vector<16x16xf32> to vector<16x14xf32>
    %38 = vector.extract_strided_slice %27 {offsets = [0, 2], sizes = [16, 14], strides = [1, 1]} : vector<16x16xf32> to vector<16x14xf32>
    %39 = arith.subf %38, %36 : vector<16x14xf32>
    %cst_27 = arith.constant 2.000000e+00 : f32
    %40 = vector.broadcast %cst_27 : f32 to vector<16x14xf32>
    %41 = arith.mulf %40, %37 : vector<16x14xf32>
    %42 = arith.addf %36, %41 : vector<16x14xf32>
    %43 = arith.addf %42, %38 : vector<16x14xf32>
    %44 = vector.extract_strided_slice %31 {offsets = [0, 0], sizes = [14, 14], strides = [1, 1]} : vector<16x14xf32> to vector<14x14xf32>
    %45 = vector.extract_strided_slice %31 {offsets = [1, 0], sizes = [14, 14], strides = [1, 1]} : vector<16x14xf32> to vector<14x14xf32>
    %cst_28 = arith.constant 2.000000e+00 : f32
    %46 = vector.broadcast %cst_28 : f32 to vector<14x14xf32>
    %47 = arith.mulf %46, %45 : vector<14x14xf32>
    %48 = arith.addf %44, %47 : vector<14x14xf32>
    %49 = vector.extract_strided_slice %31 {offsets = [2, 0], sizes = [14, 14], strides = [1, 1]} : vector<16x14xf32> to vector<14x14xf32>
    %50 = arith.addf %48, %49 : vector<14x14xf32>
    %51 = vector.extract_strided_slice %35 {offsets = [2, 0], sizes = [14, 14], strides = [1, 1]} : vector<16x14xf32> to vector<14x14xf32>
    %52 = vector.extract_strided_slice %35 {offsets = [0, 0], sizes = [14, 14], strides = [1, 1]} : vector<16x14xf32> to vector<14x14xf32>
    %53 = arith.subf %51, %52 : vector<14x14xf32>
    %54 = arith.mulf %50, %50 : vector<14x14xf32>
    %55 = arith.mulf %53, %53 : vector<14x14xf32>
    %56 = arith.addf %54, %55 : vector<14x14xf32>
    %cst_29 = arith.constant 9.99999997E-7 : f32
    %57 = vector.broadcast %cst_29 : f32 to vector<14x14xf32>
    %58 = arith.addf %56, %57 : vector<14x14xf32>
    %59 = math.sqrt %58 : vector<14x14xf32>
    %60 = vector.extract_strided_slice %39 {offsets = [0, 0], sizes = [14, 14], strides = [1, 1]} : vector<16x14xf32> to vector<14x14xf32>
    %61 = vector.extract_strided_slice %39 {offsets = [1, 0], sizes = [14, 14], strides = [1, 1]} : vector<16x14xf32> to vector<14x14xf32>
    %cst_30 = arith.constant 2.000000e+00 : f32
    %62 = vector.broadcast %cst_30 : f32 to vector<14x14xf32>
    %63 = arith.mulf %62, %61 : vector<14x14xf32>
    %64 = arith.addf %60, %63 : vector<14x14xf32>
    %65 = vector.extract_strided_slice %39 {offsets = [2, 0], sizes = [14, 14], strides = [1, 1]} : vector<16x14xf32> to vector<14x14xf32>
    %66 = arith.addf %64, %65 : vector<14x14xf32>
    %67 = vector.extract_strided_slice %43 {offsets = [2, 0], sizes = [14, 14], strides = [1, 1]} : vector<16x14xf32> to vector<14x14xf32>
    %68 = vector.extract_strided_slice %43 {offsets = [0, 0], sizes = [14, 14], strides = [1, 1]} : vector<16x14xf32> to vector<14x14xf32>
    %69 = arith.subf %67, %68 : vector<14x14xf32>
    %70 = arith.mulf %66, %66 : vector<14x14xf32>
    %71 = arith.mulf %69, %69 : vector<14x14xf32>
    %72 = arith.addf %70, %71 : vector<14x14xf32>
    %cst_31 = arith.constant 9.99999997E-7 : f32
    %73 = vector.broadcast %cst_31 : f32 to vector<14x14xf32>
    %74 = arith.addf %72, %73 : vector<14x14xf32>
    %75 = math.sqrt %74 : vector<14x14xf32>
    %76 = arith.subf %59, %75 : vector<14x14xf32>
    %77 = math.absf %76 : vector<14x14xf32>
    %78 = vector.shape_cast %77 : vector<14x14xf32> to vector<1x14x14xf32>
    %cst_32 = arith.constant dense<0.000000e+00> : vector<1xf32>
    %79 = vector.multi_reduction <add>, %78, %cst_32 [1, 2] : vector<1x14x14xf32> to vector<1xf32>
    %80 = vector.shape_cast %79 : vector<1xf32> to vector<1x1x1xf32>
    %81 = vector.extract %80[0, 0, 0] : f32 from vector<1x1x1xf32>
    %82 = vector.extract_strided_slice %31 {offsets = [0, 0], sizes = [1, 14], strides = [1, 1]} : vector<16x14xf32> to vector<1x14xf32>
    %83 = vector.extract_strided_slice %31 {offsets = [1, 0], sizes = [1, 14], strides = [1, 1]} : vector<16x14xf32> to vector<1x14xf32>
    %84 = arith.addf %82, %83 : vector<1x14xf32>
    %cst_33 = arith.constant 2.000000e+00 : f32
    %85 = vector.broadcast %cst_33 : f32 to vector<1x14xf32>
    %86 = arith.mulf %85, %84 : vector<1x14xf32>
    %87 = arith.mulf %86, %86 : vector<1x14xf32>
    %cst_34 = arith.constant 0.000000e+00 : f32
    %88 = vector.broadcast %cst_34 : f32 to vector<1x14xf32>
    %89 = arith.addf %87, %88 : vector<1x14xf32>
    %cst_35 = arith.constant 9.99999997E-7 : f32
    %90 = vector.broadcast %cst_35 : f32 to vector<1x14xf32>
    %91 = arith.addf %89, %90 : vector<1x14xf32>
    %92 = math.sqrt %91 : vector<1x14xf32>
    %93 = vector.extract_strided_slice %39 {offsets = [0, 0], sizes = [1, 14], strides = [1, 1]} : vector<16x14xf32> to vector<1x14xf32>
    %94 = vector.extract_strided_slice %39 {offsets = [1, 0], sizes = [1, 14], strides = [1, 1]} : vector<16x14xf32> to vector<1x14xf32>
    %95 = arith.addf %93, %94 : vector<1x14xf32>
    %cst_36 = arith.constant 2.000000e+00 : f32
    %96 = vector.broadcast %cst_36 : f32 to vector<1x14xf32>
    %97 = arith.mulf %96, %95 : vector<1x14xf32>
    %98 = arith.mulf %97, %97 : vector<1x14xf32>
    %cst_37 = arith.constant 0.000000e+00 : f32
    %99 = vector.broadcast %cst_37 : f32 to vector<1x14xf32>
    %100 = arith.addf %98, %99 : vector<1x14xf32>
    %cst_38 = arith.constant 9.99999997E-7 : f32
    %101 = vector.broadcast %cst_38 : f32 to vector<1x14xf32>
    %102 = arith.addf %100, %101 : vector<1x14xf32>
    %103 = math.sqrt %102 : vector<1x14xf32>
    %104 = arith.subf %92, %103 : vector<1x14xf32>
    %105 = math.absf %104 : vector<1x14xf32>
    %106 = vector.shape_cast %105 : vector<1x14xf32> to vector<1x1x14xf32>
    %cst_39 = arith.constant dense<0.000000e+00> : vector<1xf32>
    %107 = vector.multi_reduction <add>, %106, %cst_39 [1, 2] : vector<1x1x14xf32> to vector<1xf32>
    %108 = vector.shape_cast %107 : vector<1xf32> to vector<1x1x1xf32>
    %109 = vector.extract %108[0, 0, 0] : f32 from vector<1x1x1xf32>
    %110 = arith.addf %81, %109 : f32
    %111 = vector.extract_strided_slice %31 {offsets = [15, 0], sizes = [1, 14], strides = [1, 1]} : vector<16x14xf32> to vector<1x14xf32>
    %112 = vector.extract_strided_slice %31 {offsets = [14, 0], sizes = [1, 14], strides = [1, 1]} : vector<16x14xf32> to vector<1x14xf32>
    %113 = arith.addf %111, %112 : vector<1x14xf32>
    %cst_40 = arith.constant 2.000000e+00 : f32
    %114 = vector.broadcast %cst_40 : f32 to vector<1x14xf32>
    %115 = arith.mulf %114, %113 : vector<1x14xf32>
    %116 = arith.mulf %115, %115 : vector<1x14xf32>
    %cst_41 = arith.constant 0.000000e+00 : f32
    %117 = vector.broadcast %cst_41 : f32 to vector<1x14xf32>
    %118 = arith.addf %116, %117 : vector<1x14xf32>
    %cst_42 = arith.constant 9.99999997E-7 : f32
    %119 = vector.broadcast %cst_42 : f32 to vector<1x14xf32>
    %120 = arith.addf %118, %119 : vector<1x14xf32>
    %121 = math.sqrt %120 : vector<1x14xf32>
    %122 = vector.extract_strided_slice %39 {offsets = [15, 0], sizes = [1, 14], strides = [1, 1]} : vector<16x14xf32> to vector<1x14xf32>
    %123 = vector.extract_strided_slice %39 {offsets = [14, 0], sizes = [1, 14], strides = [1, 1]} : vector<16x14xf32> to vector<1x14xf32>
    %124 = arith.addf %122, %123 : vector<1x14xf32>
    %cst_43 = arith.constant 2.000000e+00 : f32
    %125 = vector.broadcast %cst_43 : f32 to vector<1x14xf32>
    %126 = arith.mulf %125, %124 : vector<1x14xf32>
    %127 = arith.mulf %126, %126 : vector<1x14xf32>
    %cst_44 = arith.constant 0.000000e+00 : f32
    %128 = vector.broadcast %cst_44 : f32 to vector<1x14xf32>
    %129 = arith.addf %127, %128 : vector<1x14xf32>
    %cst_45 = arith.constant 9.99999997E-7 : f32
    %130 = vector.broadcast %cst_45 : f32 to vector<1x14xf32>
    %131 = arith.addf %129, %130 : vector<1x14xf32>
    %132 = math.sqrt %131 : vector<1x14xf32>
    %133 = arith.subf %121, %132 : vector<1x14xf32>
    %134 = math.absf %133 : vector<1x14xf32>
    %135 = vector.shape_cast %134 : vector<1x14xf32> to vector<1x1x14xf32>
    %cst_46 = arith.constant dense<0.000000e+00> : vector<1xf32>
    %136 = vector.multi_reduction <add>, %135, %cst_46 [1, 2] : vector<1x1x14xf32> to vector<1xf32>
    %137 = vector.shape_cast %136 : vector<1xf32> to vector<1x1x1xf32>
    %138 = vector.extract %137[0, 0, 0] : f32 from vector<1x1x1xf32>
    %139 = arith.addf %110, %138 : f32
    %140 = vector.extract_strided_slice %13 {offsets = [0, 0], sizes = [16, 1], strides = [1, 1]} : vector<16x16xf32> to vector<16x1xf32>
    %141 = vector.extract_strided_slice %13 {offsets = [0, 1], sizes = [16, 1], strides = [1, 1]} : vector<16x16xf32> to vector<16x1xf32>
    %142 = arith.addf %140, %141 : vector<16x1xf32>
    %cst_47 = arith.constant 2.000000e+00 : f32
    %143 = vector.broadcast %cst_47 : f32 to vector<16x1xf32>
    %144 = arith.mulf %143, %142 : vector<16x1xf32>
    %145 = vector.extract_strided_slice %144 {offsets = [2, 0], sizes = [14, 1], strides = [1, 1]} : vector<16x1xf32> to vector<14x1xf32>
    %146 = vector.extract_strided_slice %144 {offsets = [0, 0], sizes = [14, 1], strides = [1, 1]} : vector<16x1xf32> to vector<14x1xf32>
    %147 = arith.subf %145, %146 : vector<14x1xf32>
    %148 = arith.mulf %147, %147 : vector<14x1xf32>
    %cst_48 = arith.constant 0.000000e+00 : f32
    %149 = vector.broadcast %cst_48 : f32 to vector<14x1xf32>
    %150 = arith.addf %149, %148 : vector<14x1xf32>
    %cst_49 = arith.constant 9.99999997E-7 : f32
    %151 = vector.broadcast %cst_49 : f32 to vector<14x1xf32>
    %152 = arith.addf %150, %151 : vector<14x1xf32>
    %153 = math.sqrt %152 : vector<14x1xf32>
    %154 = vector.extract_strided_slice %27 {offsets = [0, 0], sizes = [16, 1], strides = [1, 1]} : vector<16x16xf32> to vector<16x1xf32>
    %155 = vector.extract_strided_slice %27 {offsets = [0, 1], sizes = [16, 1], strides = [1, 1]} : vector<16x16xf32> to vector<16x1xf32>
    %156 = arith.addf %154, %155 : vector<16x1xf32>
    %cst_50 = arith.constant 2.000000e+00 : f32
    %157 = vector.broadcast %cst_50 : f32 to vector<16x1xf32>
    %158 = arith.mulf %157, %156 : vector<16x1xf32>
    %159 = vector.extract_strided_slice %158 {offsets = [2, 0], sizes = [14, 1], strides = [1, 1]} : vector<16x1xf32> to vector<14x1xf32>
    %160 = vector.extract_strided_slice %158 {offsets = [0, 0], sizes = [14, 1], strides = [1, 1]} : vector<16x1xf32> to vector<14x1xf32>
    %161 = arith.subf %159, %160 : vector<14x1xf32>
    %162 = arith.mulf %161, %161 : vector<14x1xf32>
    %cst_51 = arith.constant 0.000000e+00 : f32
    %163 = vector.broadcast %cst_51 : f32 to vector<14x1xf32>
    %164 = arith.addf %163, %162 : vector<14x1xf32>
    %cst_52 = arith.constant 9.99999997E-7 : f32
    %165 = vector.broadcast %cst_52 : f32 to vector<14x1xf32>
    %166 = arith.addf %164, %165 : vector<14x1xf32>
    %167 = math.sqrt %166 : vector<14x1xf32>
    %168 = arith.subf %153, %167 : vector<14x1xf32>
    %169 = math.absf %168 : vector<14x1xf32>
    %170 = vector.shape_cast %169 : vector<14x1xf32> to vector<1x14x1xf32>
    %cst_53 = arith.constant dense<0.000000e+00> : vector<1xf32>
    %171 = vector.multi_reduction <add>, %170, %cst_53 [1, 2] : vector<1x14x1xf32> to vector<1xf32>
    %172 = vector.shape_cast %171 : vector<1xf32> to vector<1x1x1xf32>
    %173 = vector.extract %172[0, 0, 0] : f32 from vector<1x1x1xf32>
    %174 = arith.addf %139, %173 : f32
    %175 = vector.extract_strided_slice %13 {offsets = [0, 15], sizes = [16, 1], strides = [1, 1]} : vector<16x16xf32> to vector<16x1xf32>
    %176 = vector.extract_strided_slice %13 {offsets = [0, 14], sizes = [16, 1], strides = [1, 1]} : vector<16x16xf32> to vector<16x1xf32>
    %177 = arith.addf %175, %176 : vector<16x1xf32>
    %cst_54 = arith.constant 2.000000e+00 : f32
    %178 = vector.broadcast %cst_54 : f32 to vector<16x1xf32>
    %179 = arith.mulf %178, %177 : vector<16x1xf32>
    %180 = vector.extract_strided_slice %179 {offsets = [2, 0], sizes = [14, 1], strides = [1, 1]} : vector<16x1xf32> to vector<14x1xf32>
    %181 = vector.extract_strided_slice %179 {offsets = [0, 0], sizes = [14, 1], strides = [1, 1]} : vector<16x1xf32> to vector<14x1xf32>
    %182 = arith.subf %180, %181 : vector<14x1xf32>
    %183 = arith.mulf %182, %182 : vector<14x1xf32>
    %cst_55 = arith.constant 0.000000e+00 : f32
    %184 = vector.broadcast %cst_55 : f32 to vector<14x1xf32>
    %185 = arith.addf %184, %183 : vector<14x1xf32>
    %cst_56 = arith.constant 9.99999997E-7 : f32
    %186 = vector.broadcast %cst_56 : f32 to vector<14x1xf32>
    %187 = arith.addf %185, %186 : vector<14x1xf32>
    %188 = math.sqrt %187 : vector<14x1xf32>
    %189 = vector.extract_strided_slice %27 {offsets = [0, 15], sizes = [16, 1], strides = [1, 1]} : vector<16x16xf32> to vector<16x1xf32>
    %190 = vector.extract_strided_slice %27 {offsets = [0, 14], sizes = [16, 1], strides = [1, 1]} : vector<16x16xf32> to vector<16x1xf32>
    %191 = arith.addf %189, %190 : vector<16x1xf32>
    %cst_57 = arith.constant 2.000000e+00 : f32
    %192 = vector.broadcast %cst_57 : f32 to vector<16x1xf32>
    %193 = arith.mulf %192, %191 : vector<16x1xf32>
    %194 = vector.extract_strided_slice %193 {offsets = [2, 0], sizes = [14, 1], strides = [1, 1]} : vector<16x1xf32> to vector<14x1xf32>
    %195 = vector.extract_strided_slice %193 {offsets = [0, 0], sizes = [14, 1], strides = [1, 1]} : vector<16x1xf32> to vector<14x1xf32>
    %196 = arith.subf %194, %195 : vector<14x1xf32>
    %197 = arith.mulf %196, %196 : vector<14x1xf32>
    %cst_58 = arith.constant 0.000000e+00 : f32
    %198 = vector.broadcast %cst_58 : f32 to vector<14x1xf32>
    %199 = arith.addf %198, %197 : vector<14x1xf32>
    %cst_59 = arith.constant 9.99999997E-7 : f32
    %200 = vector.broadcast %cst_59 : f32 to vector<14x1xf32>
    %201 = arith.addf %199, %200 : vector<14x1xf32>
    %202 = math.sqrt %201 : vector<14x1xf32>
    %203 = arith.subf %188, %202 : vector<14x1xf32>
    %204 = math.absf %203 : vector<14x1xf32>
    %205 = vector.shape_cast %204 : vector<14x1xf32> to vector<1x14x1xf32>
    %cst_60 = arith.constant dense<0.000000e+00> : vector<1xf32>
    %206 = vector.multi_reduction <add>, %205, %cst_60 [1, 2] : vector<1x14x1xf32> to vector<1xf32>
    %207 = vector.shape_cast %206 : vector<1xf32> to vector<1x1x1xf32>
    %208 = vector.extract %207[0, 0, 0] : f32 from vector<1x1x1xf32>
    %209 = arith.addf %174, %208 : f32
    %210 = tpu.iota {dimensions = array<i32: 2>} : vector<1x1x128xi32>
    %c0_i32 = arith.constant 0 : i32
    %211 = vector.broadcast %c0_i32 : i32 to vector<1x1x128xi32>
    %212 = arith.cmpi eq, %210, %211 : vector<1x1x128xi32>
    %cst_61 = arith.constant 0.000000e+00 : f32
    %213 = vector.broadcast %209 : f32 to vector<1x1x128xf32>
    %214 = vector.broadcast %cst_61 : f32 to vector<1x1x128xf32>
    %215 = arith.select %212, %213, %214 : vector<1x1x128xi1>, vector<1x1x128xf32>
    %c0_62 = arith.constant 0 : index
    %c0_63 = arith.constant 0 : index
    %c0_64 = arith.constant 0 : index
    %216 = vector.load %arg3[%c0_62, %c0_63, %c0_64] : memref<1x1x128xf32, #tpu.memory_space<vmem>>, vector<1x1x128xf32>
    tpu.vector_store %arg3[%c0_62, %c0_63, %c0_64], %215 {strides = array<i32>} : memref<1x1x128xf32, #tpu.memory_space<vmem>>, vector<1x1x128xf32>,
    return
  }
  func.func @transform_0(%arg0: i32) -> (i32, i32, i32, i32) {
    %c0_i32 = arith.constant 0 : i32
    %c0_i32_0 = arith.constant 0 : i32
    %c0_i32_1 = arith.constant 0 : i32
    %c0_i32_2 = arith.constant 0 : i32
    return %arg0, %c0_i32, %c0_i32_0, %c0_i32_1 : i32, i32, i32, i32
  }
  func.func @transform_1(%arg0: i32) -> (i32, i32, i32, i32) {
    %c0_i32 = arith.constant 0 : i32
    %c0_i32_0 = arith.constant 0 : i32
    %c0_i32_1 = arith.constant 0 : i32
    %c0_i32_2 = arith.constant 0 : i32
    return %arg0, %c0_i32, %c0_i32_0, %c0_i32_1 : i32, i32, i32, i32
  }
  func.func @transform_2(%arg0: i32) -> (i32, i32, i32) {
    %c0_i32 = arith.constant 0 : i32
    %c0_i32_0 = arith.constant 0 : i32
    %c0_i32_1 = arith.constant 0 : i32
    return %arg0, %c0_i32, %c0_i32_0 : i32, i32, i32
  }
}

</mosaic_0001>

<bundles_post_ra>
// kernel: canny_loss.1
= control target key start
LH: loop header
LB: loop body
LE: loop exit
PB: predicated region body
PF: predicated region fallthrough
CT: control target
= control target key end

     0   :  { %7 = vsyncpa [#allocation3], 0  ;;  %s1588_s0 = inlined_call_operand.hbm [shape: f32[2,4,16,16], index: 0, kind: input, shape index: {}]   ;;  %s1589_s1 = inlined_call_operand.hbm [shape: f32[2,4,16,16], index: 1, kind: input, shape index: {}]   ;;  %s1590_s2 = inlined_call_operand.hbm [shape: f32[2,1,128], index: 2, kind: output, shape index: {}]  }
   0x1   :  { %9 = vsyncpa [#allocation3 + $0x1], 0 }
   0x2   :  { %10 = vsyncpa [#allocation6], 0 }
   0x3   :  { %12 = vsyncpa [#allocation6 + $0x1], 0 }
   0x4   :  { %13 = vsyncpa [#allocation4], 0 }
   0x5   :  { %15 = vsyncpa [#allocation4 + $0x1], 0  ;;  %s1141_s9 = smov 0   ;;  %s1143_s10 = smov 0  }
   0x6   :  { %s1145_s11 = smov 0   ;;  %s1147_s12 = smov 0  }
   0x7 LB: > { %s1162_s13 = sadd.s32 4294967295, %s1114_s12   ;;  %s860_s14 = sadd.s32 4294967294, %s1114_s12   ;;  %s1114_s12 = sphi %s1147_s12, %s1605_s12   ;;  %s1110_s11 = sphi %s1145_s11, %s1604_s11   ;;  %s1106_s10 = sphi %s1143_s10, %s1603_s10   ;;  %s1102_s9 = sphi %s1141_s9, %s1602_s9  }
   0x8   : > { %s1166_s15 = sadd.s32 1, %s1114_s12   ;;  %s28_s16 = sadd.s32 1, %s1110_s11 }
   0x9   : > { %s25_s17 = ssub.s32 %s1114_s12, %s1166_s15  ;;  %p35_p0 = scmp.ne.s32.totalorder %s1110_s11, %s1106_s10 }
   0xa   : > { %p26_p1 = scmp.eq.s32.totalorder %s25_s17, 0  ;;  %p36_p2 = scmp.eq.s32.totalorder %s1114_s12, 0 }
   0xb   : > { %p41_p3 = scmp.ne.s32.totalorder %s1106_s10, %s1102_s9  ;;  %p42_p4 = scmp.eq.s32.totalorder %s1162_s13, 0 }
   0xc   : > { %s1178_s18 = scalar_select %p26_p1, %s1110_s11, %s28_s16  }
   0xd   : > { %p37_p5 = por %p36_p2, %p35_p0  ;;  %p1180_p6 = por %p42_p4, %p41_p3 }
   0xe   : > { %p91_p7 = scmp.eq.s32.totalorder %s1162_s13, 1  ;;  %p97_p8 = scmp.eq.s32.totalorder %s860_s14, 1 }
   0xf   : > { %s1593_s19 = scalar_select %p1180_p6, 1, 0 }
  0x10   : > { %p911_p10 = scmp.lt.s32.totalorder %s1114_s12, 2  ;;  %p1187_p11 = por %p91_p7, %p35_p0 }
  0x11   : > { %p1191_p12 = por %p97_p8, %p41_p3  ;;  %s1196_s22 = sand.u32 1, %s1110_s11  }
  0x12   : > { %s1594_s20 = scalar_select %p1187_p11, 1, 0 }
  0x13   : > { %s1595_s21 = scalar_select %p1191_p12, 1, 0 }
  0x14   : > { %s879_s23 = sshll.u32 %s1114_s12, 10  ;;  %s881_s24 = smul.u32 48, %s1196_s22 }
  0x15   : > { %s1205_s27 = scalar_lea.hbm %s1588_s0, %s879_s23  ;;  %p1207_p13 = pnand %p911_p10, %p37_p5 }
  0x16   : > { %s121_s29 = scalar_lea.vmem [#allocation2], %s881_s24  ;;  %s118_s3 = scalar_lea.sflag [#allocation3], %s1196_s22 }
  0x17   : > { %s128_s30 = sshll.u32 %s121_s29, 4  ;;  %s984_s4 = scalar_lea.hbm %s1205_s27, 768  ;;  %s1213_s30 = int_to_ptr.vmem [resolvable:$true] %s128_s30 }
  0x18   : > { %p985_p0 = scmp.ne.s32.totalorder %s1205_s27, %s984_s4  ;;  %p986_p1 = pneg %p1207_p13 }
  0x19   : > { %s989_s7 = scalar_lea.hbm %s1588_s0, 2048  ;;  %p990_p4 = scmp.lt.u32.totalorder %s1205_s27, %s1588_s0 }
  0x1a   : > { %p987_p2 = pnand %p986_p1, %p985_p0  ;;  %p991_p5 = scmp.lt.u32.totalorder %s989_s7, %s984_s4 }
  0x1b   : > { %p993_p8 = scmp.lt.u32.totalorder %s984_s4, %s1205_s27 }
  0x1c   : > { %p988_p3 = pneg %p987_p2  ;;  %p992_p7 = por %p991_p5, %p990_p4 }
  0x1e   : > { %p994_p10 = por %p993_p8, %p992_p7 }
  0x20   : > { %p995_p9 = pnand %p994_p10, %p988_p3 }
  0x22   : > { %998 = shalt.err (!%p995_p9)
}
  0x23   : > { %s999_s16 = scalar_lea.vmem %s1213_s30, 768  ;;  %s1116_s17 = smov [#allocation2]  }
  0x24   : > { %p1000_p0 = scmp.ne.s32.totalorder %s1213_s30, %s999_s16  ;;  %s1004_s25 = sshll.u32 %s1116_s17, 4  ;;  %s1005_s25 = int_to_ptr.vmem [resolvable:$false] %s1004_s25 }
  0x25   : > { %s1006_s26 = scalar_lea.vmem %s1005_s25, 1536  ;;  %p1007_p11 = scmp.lt.s32.totalorder %s1213_s30, %s1005_s25 }
  0x26   : > { %p1002_p2 = pnand %p1000_p0, %p986_p1  ;;  %p1008_p4 = scmp.lt.s32.totalorder %s1006_s26, %s999_s16 }
  0x28   : > { %p1003_p12 = pneg %p1002_p2  ;;  %p1009_p5 = por %p1008_p4, %p1007_p11 }
  0x2a   : > { %p1010_p7 = pnand %p1009_p5, %p1003_p12 }
  0x2c   : > { %1013 = shalt.err (!%p1010_p7)
}
  0x2d   : > { %s1117_s29 = smov 128   ;;  %s1118_s4 = smov 8  }
  0x2e   : > { %903 = dma.hbm_to_vmem [thread:$0]  (!%p1207_p13), %s1205_s27, 768, %s1213_s30, %s118_s3, %s1117_s29, %s1117_s29, %s1118_s4  }
  0x2f   : > { %p867_p9 = scmp.ge.s32.totalorder %s1114_s12, 1  ;;  %p157_p11 = scmp.lt.s32.totalorder %s1114_s12, 3 }
  0x30   : > { %s1257_s8 = scalar_lea.hbm %s1589_s1, %s879_s23  ;;  %s142_s14 = scalar_lea.vmem [#allocation5], %s881_s24 }
  0x31   : > { %p1248_p12 = pnand %p867_p9, %p157_p11  ;;  %s149_s16 = sshll.u32 %s142_s14, 4  ;;  %s1261_s16 = int_to_ptr.vmem [resolvable:$true] %s149_s16 }
  0x32   : > { %s139_s27 = scalar_lea.sflag [#allocation6], %s1196_s22  ;;  %s1014_s30 = scalar_lea.hbm %s1257_s8, 768 }
  0x33   : > { %p1015_p3 = scmp.ne.s32.totalorder %s1257_s8, %s1014_s30  ;;  %s1019_s23 = scalar_lea.hbm %s1589_s1, 2048 }
  0x34   : > { %p1020_p0 = scmp.lt.u32.totalorder %s1257_s8, %s1589_s1  ;;  %p1021_p2 = scmp.lt.u32.totalorder %s1019_s23, %s1014_s30 }
  0x35   : > { %p1017_p8 = pnand %p1015_p3, %p986_p1  ;;  %p1023_p5 = scmp.lt.u32.totalorder %s1014_s30, %s1257_s8 }
  0x36   : > { %p1022_p4 = por %p1021_p2, %p1020_p0 }
  0x37   : > { %p1018_p10 = pneg %p1017_p8 }
  0x38   : > { %p1024_p7 = por %p1023_p5, %p1022_p4 }
  0x3a   : > { %p1025_p9 = pnand %p1024_p7, %p1018_p10 }
  0x3c   : > { %1028 = shalt.err (!%p1025_p9)
}
  0x3d   : > { %s1029_s24 = scalar_lea.vmem %s1261_s16, 768  ;;  %s1119_s6 = smov [#allocation5]  }
  0x3e   : > { %p1030_p11 = scmp.ne.s32.totalorder %s1261_s16, %s1029_s24  ;;  %s1034_s7 = sshll.u32 %s1119_s6, 4  ;;  %s1035_s7 = int_to_ptr.vmem [resolvable:$false] %s1034_s7 }
  0x3f   : > { %s1036_s14 = scalar_lea.vmem %s1035_s7, 1536  ;;  %p1037_p6 = scmp.lt.s32.totalorder %s1261_s16, %s1035_s7 }
  0x40   : > { %p1032_p3 = pnand %p1030_p11, %p986_p1  ;;  %p1038_p0 = scmp.lt.s32.totalorder %s1036_s14, %s1029_s24 }
  0x42   : > { %p1033_p8 = pneg %p1032_p3  ;;  %p1039_p2 = por %p1038_p0, %p1037_p6 }
  0x44   : > { %p1040_p4 = pnand %p1039_p2, %p1033_p8 }
  0x46   : > { %1043 = shalt.err (!%p1040_p4)
}
  0x47   : > { %906 = dma.hbm_to_vmem [thread:$0]  (!%p1207_p13), %s1257_s8, 768, %s1261_s16, %s139_s27, %s1117_s29, %s1117_s29, %s1118_s4  }
  0x48   : > { %161 = sbr.rel (%p1248_p12) target bundleno = 722 (0x2d2), region = 28  ;;  %s1295_s30 = sand.u32 (!%p1248_p12), 1, %s1106_s10  }
  0x49   : > { %s883_s3 = smul.u32 (!%p1248_p12), 48, %s1295_s30  ;;  %s164_s17 = scalar_lea.sflag (!%p1248_p12), [#allocation3], %s1295_s30 }
  0x4a   : > { %p1598_p6 = scmp.ne.s32.totalorder (!%p1248_p12), %s1593_s19, 0 }
  0x4b   : > { %s167_s28 = scalar_lea.vmem (!%p1248_p12), [#allocation2], %s883_s3 }
  0x4f   : > { %1089 = dma.done.wait (%p1598_p6), %s164_s17, 768  }
  0x50   : > { %1091 = vsyncadd (%p1598_p6), %s164_s17, 4294966528  ;;  %s173_s22 = scalar_lea.sflag [#allocation6], %s1295_s30  ;;  %s1304_s29 = scalar_lea.vmem [#allocation5], %s883_s3 }
  0x51   : > { %1093 = dma.done.wait (%p1598_p6), %s173_s22, 768  }
  0x52   : > { %1095 = vsyncadd (%p1598_p6), %s173_s22, 4294966528  ;;  %v202_v0 = vld [vmem:[%s167_s28 + $0x8] sm:$0xff]  ;;  %v869_v1 = vld [vmem:[%s167_s28 + $0x18] sm:$0xff]  ;;  %s1120_s19 = smov 126   ;;  %s1121_s4 = smov 127   ;;  %vm321_vm0 = vcmask 1041408  }
  0x53   : > { %v871_v2 = vld [vmem:[%s167_s28 + $0x28] sm:$0xff]  ;;  %v204_v3 = vmul.f32 0.299, %v202_v0  ;;  %v209_v4 = vmul.f32 0.587, %v869_v1  ;;  %v201_v6 = vld [vmem:[%s167_s28] sm:$0xff] }
  0x54   : > { %v216_v5 = vmul.f32 0.114, %v871_v2  ;;  %v868_v7 = vld [vmem:[%s167_s28 + $0x10] sm:$0xff]  ;;  %v870_v8 = vld [vmem:[%s167_s28 + $0x20] sm:$0xff]  ;;  %v203_v10 = vmul.f32 0.299, %v201_v6 }
  0x55   : > { %v211_v9 = vadd.f32 %v209_v4, %v204_v3  ;;  %v208_v11 = vmul.f32 0.587, %v868_v7  ;;  %v215_v12 = vmul.f32 0.114, %v870_v8  ;;  %v219_v13 = vld [vmem:[%s1304_s29] sm:$0xff]  ;;  %v872_v14 = vld [vmem:[%s1304_s29 + $0x10] sm:$0xff] }
  0x56   : > { %v874_v15 = vld [vmem:[%s1304_s29 + $0x20] sm:$0xff]  ;;  %v221_v18 = vmul.f32 0.299, %v219_v13  ;;  %v226_v19 = vmul.f32 0.587, %v872_v14  ;;  %v220_v20 = vld [vmem:[%s1304_s29 + $0x8] sm:$0xff] }
  0x57   : > { %v1313_v16 = vadd.f32 %v216_v5, %v211_v9  ;;  %v210_v17 = vadd.f32 %v208_v11, %v203_v10  ;;  %v873_v21 = vld [vmem:[%s1304_s29 + $0x18] sm:$0xff]  ;;  %v233_v22 = vmul.f32 0.114, %v874_v15  ;;  %v222_v23 = vmul.f32 0.299, %v220_v20  ;;  %v875_v27 = vld [vmem:[%s1304_s29 + $0x28] sm:$0xff] }
  0x58   : > { %v227_v24 = vmul.f32 0.587, %v873_v21  ;;  %v228_v26 = vadd.f32 %v226_v19, %v221_v18  ;;  %v234_v29 = vmul.f32 0.114, %v875_v27  ;;  %s1122_s5 = smov 2   ;;  %s1123_s8 = smov 1  }
  0x59   : > { %261 = vrot.lane.b32.xlu1 %v1313_v16, %s1120_s19  ;;  %v1319_v25 = vadd.f32 %v215_v12, %v210_v17  ;;  %v248_v35 = vmul.f32 2.0, %v1313_v16  ;;  %vm311_vm1 = vcmask 1045504   ;;  %vm301_vm2 = vcmask 1046528   ;;  %s1124_s16 = smov 113   ;;  %s876_s14 = sshll.u32 %s1162_s13, 4 }
  0x5a   : > { %v229_v28 = vadd.f32 %v227_v24, %v222_v23  ;;  %v1324_v30 = vadd.f32 %v233_v22, %v228_v26  ;;  %s200_s17 = scalar_lea.vmem [#allocation7], %s1295_s30  ;;  %p1599_p1 = scmp.ne.s32.totalorder %s1594_s20, 0 }
  0x5b   : > { %259 = vrot.lane.b32.xlu0 %v1319_v25, %s1120_s19  ;;  %v247_v31 = vmul.f32 2.0, %v1319_v25  ;;  %s771_s28 = sshll.u32 %s200_s17, 4  ;;  %s1546_s28 = int_to_ptr.vmem [resolvable:$true] %s771_s28 }
  0x5c   : > { %v1327_v32 = vadd.f32 %v234_v29, %v229_v28  ;;  %v277_v33 = vmul.f32 2.0, %v1324_v30  ;;  %s1044_s13 = scalar_lea.vmem %s1546_s28, 16 }
  0x5d   : > { %p1045_p13 = scmp.ne.s32.totalorder %s1546_s28, %s1044_s13 }
  0x5e   : > { %281 = vrot.lane.b32.xlu1 %v277_v33, %s1121_s4  ;;  %v278_v34 = vmul.f32 2.0, %v1327_v32 }
  0x5f   : > { %251 = vrot.lane.b32.xlu0 %v247_v31, %s1121_s4  ;;  %p1046_p12 = pnand %p1045_p13, %p1599_p1 }
  0x61   : > { %p1047_p10 = pneg %p1046_p12 }
  0x62   : > { %283 = vrot.lane.b32.xlu1 %v278_v34, %s1121_s4 }
  0x63   : > { %253 = vrot.lane.b32.xlu0 %v248_v35, %s1121_s4 }
  0x66   : > { %291 = vrot.lane.b32.xlu1 %v1327_v32, %s1120_s19 }
  0x67   : > { %289 = vrot.lane.b32.xlu0 %v1324_v30, %s1120_s19 }
  0x6a   : > { %241 = vrot.lane.b32.xlu1 %v1313_v16, %s1122_s5 }
  0x6b   : > { %239 = vrot.lane.b32.xlu0 %v1319_v25, %s1122_s5 }
  0x6e   : > { %271 = vrot.lane.b32.xlu1 %v1327_v32, %s1122_s5 }
  0x6f   : > { %269 = vrot.lane.b32.xlu0 %v1324_v30, %s1122_s5 }
  0x72   : > { %648 = vrot.lane.b32.xlu1 %v1313_v16, %s1123_s8 }
  0x73   : > { %646 = vrot.lane.b32.xlu0 %v1319_v25, %s1123_s8 }
  0x76   : > { %687 = vrot.lane.b32.xlu1 %v1327_v32, %s1123_s8 }
  0x77   : > { %685 = vrot.lane.b32.xlu0 %v1324_v30, %s1123_s8  ;;  %s1125_s8 = smov [#allocation7]  }
  0xcb   : > { %v262_v36 = vpop.permute.xlu1 %261 }
  0xcd   : > { %v260_v37 = vpop.permute.xlu0 %259 }
  0xd0   : > { %v282_v38 = vpop.permute.xlu1 %281 }
  0xd1   : > { %v252_v39 = vpop.permute.xlu0 %251  ;;  %v287_v47 = vadd.f32 %v282_v38, %v1324_v30 }
  0xd2   : > { %v257_v40 = vadd.f32 %v252_v39, %v1319_v25 }
  0xd4   : > { %v265_v41 = vadd.f32 %v260_v37, %v257_v40  ;;  %v284_v42 = vpop.permute.xlu1 %283 }
  0xd5   : > { %v254_v43 = vpop.permute.xlu0 %253  ;;  %v288_v45 = vadd.f32 %v284_v42, %v1327_v32 }
  0xd6   : > { %v322_v44 = vrot.slane %v265_v41, 6  ;;  %v258_v46 = vadd.f32 %v254_v43, %v1313_v16 }
  0xd8   : > { %v266_v48 = vadd.f32 %v262_v36, %v258_v46  ;;  %v327_v49 = vsub.f32 %v265_v41, %v322_v44  ;;  %v292_v50 = vpop.permute.xlu1 %291 }
  0xd9   : > { %v290_v51 = vpop.permute.xlu0 %289  ;;  %v296_v53 = vadd.f32 %v292_v50, %v288_v45 }
  0xda   : > { %v323_v52 = vrot.slane %v266_v48, 6  ;;  %v295_v54 = vadd.f32 %v290_v51, %v287_v47  ;;  %v331_v58 = vmul.f32 %v327_v49, %v327_v49 }
  0xdb   : > { %v385_v56 = vrot.slane %v296_v53, 6 }
  0xdc   : > { %v324_v55 = vsel %vm321_vm0, %v322_v44, %v323_v52  ;;  %v384_v57 = vrot.slane %v295_v54, 6  ;;  %v335_v1 = vrot.slane %v331_v58, 2  ;;  %v242_v9 = vpop.permute.xlu1 %241 }
  0xdd   : > { %v328_v59 = vsub.f32 %v266_v48, %v324_v55  ;;  %v240_v8 = vpop.permute.xlu0 %239  ;;  %v1373_v14 = vsub.f32 %v1313_v16, %v242_v9 }
  0xde   : > { %v389_v60 = vsub.f32 %v295_v54, %v384_v57  ;;  %v386_v61 = vsel %vm321_vm0, %v384_v57, %v385_v56  ;;  %v245_v23 = vsub.f32 %v1319_v25, %v240_v8 }
  0xdf   : > { %v332_v62 = vmul.f32 %v328_v59, %v328_v59  ;;  %v390_v63 = vsub.f32 %v296_v53, %v386_v61  ;;  %v496_v22 = vrot.slane %v1373_v14, 7  ;;  %v298_v46 = vmul.f32 2.0, %v1373_v14 }
  0xe0   : > { %v393_v0 = vmul.f32 %v389_v60, %v389_v60  ;;  %v272_v11 = vpop.permute.xlu1 %271  ;;  %v450_v34 = vrot.slane %v245_v23, 1  ;;  %v297_v47 = vmul.f32 2.0, %v245_v23 }
  0xe1   : > { %v336_v2 = vrot.slane %v332_v62, 2  ;;  %v394_v3 = vmul.f32 %v390_v63, %v390_v63  ;;  %v270_v10 = vpop.permute.xlu0 %269  ;;  %v1377_v19 = vsub.f32 %v1327_v32, %v272_v11  ;;  %v498_v33 = vadd.f32 %v496_v22, %v1373_v14 }
  0xe2   : > { %v397_v4 = vrot.slane %v393_v0, 2  ;;  %v1385_v26 = vsub.f32 %v1324_v30, %v270_v10  ;;  %v452_v42 = vadd.f32 %v450_v34, %v245_v23  ;;  %v303_v56 = vrot.slane %v298_v46, 1 }
  0xe3   : > { %340 = vrot.lane.b32.xlu1 %v336_v2, %s1122_s5  ;;  %v337_v5 = vsel %vm311_vm1, %v335_v1, %v336_v2  ;;  %v398_v6 = vrot.slane %v394_v3, 2  ;;  %v510_v28 = vrot.slane %v1377_v19, 7  ;;  %v499_v41 = vmul.f32 2.0, %v498_v33 }
  0xe4   : > { %338 = vrot.lane.b32.xlu0 %v337_v5, %s1122_s5  ;;  %v649_v13 = vpop.permute.xlu1 %648  ;;  %v464_v36 = vrot.slane %v1385_v26, 1  ;;  %v453_v52 = vmul.f32 2.0, %v452_v42  ;;  %v302_v57 = vrot.slane %v297_v47, 1  ;;  %v363_v60 = vmul.f32 2.0, %v1377_v19 }
  0xe5   : > { %v399_v7 = vsel %vm311_vm1, %v397_v4, %v398_v6  ;;  %v647_v12 = vpop.permute.xlu0 %646  ;;  %v653_v20 = vadd.f32 %v649_v13, %v1313_v16  ;;  %v512_v38 = vadd.f32 %v510_v28, %v1377_v19  ;;  %v500_v51 = vmul.f32 %v499_v41, %v499_v41 }
  0xe6   : > { %v652_v17 = vadd.f32 %v647_v12, %v1319_v25  ;;  %v466_v44 = vadd.f32 %v464_v36, %v1385_v26  ;;  %v362_v61 = vmul.f32 2.0, %v1385_v26  ;;  %v454_v1 = vmul.f32 %v453_v52, %v453_v52 }
  0xe7   : > { %402 = vrot.lane.b32.xlu1 %v398_v6, %s1122_s5  ;;  %v655_v29 = vmul.f32 2.0, %v653_v20  ;;  %v513_v48 = vmul.f32 2.0, %v512_v38  ;;  %v1397_v0 = vadd.f32 1e-06, %v500_v51  ;;  %v313_v2 = vrot.slane %v1373_v14, 2 }
  0xe8   : > { %400 = vrot.lane.b32.xlu0 %v399_v7, %s1122_s5  ;;  %v688_v18 = vpop.permute.xlu1 %687  ;;  %v654_v27 = vmul.f32 2.0, %v652_v17  ;;  %v467_v54 = vmul.f32 2.0, %v466_v44  ;;  %v304_v5 = vsel %vm301_vm2, %v302_v57, %v303_v56  ;;  %v312_v6 = vrot.slane %v245_v23, 2  ;;  %s759_s5 = scalar_lea.sflag [#allocation4], %s1295_s30 }
  0xe9   : > { %v686_v15 = vpop.permute.xlu0 %685  ;;  %v692_v24 = vadd.f32 %v688_v18, %v1327_v32  ;;  %v659_v39 = vrot.slane %v655_v29, 6  ;;  %v514_v58 = vmul.f32 %v513_v48, %v513_v48  ;;  %v367_v9 = vrot.slane %v363_v60, 1 }
  0xea   : > { %v691_v21 = vadd.f32 %v686_v15, %v1324_v30  ;;  %v658_v37 = vrot.slane %v654_v27, 6  ;;  %v468_v3 = vmul.f32 %v467_v54, %v467_v54  ;;  %v366_v10 = vrot.slane %v362_v61, 1 }
  0xeb   : > { %544 = vrot.lane.b32.xlu1 %v1313_v16, %s1121_s4  ;;  %v694_v35 = vmul.f32 2.0, %v692_v24  ;;  %v1403_v7 = vadd.f32 1e-06, %v514_v58  ;;  %v1407_v13 = vadd.f32 1e-06, %v454_v1  ;;  %v308_v15 = vadd.f32 %v303_v56, %v1373_v14 }
  0xec   : > { %542 = vrot.lane.b32.xlu0 %v1319_v25, %s1121_s4  ;;  %v693_v31 = vmul.f32 2.0, %v691_v21  ;;  %v663_v45 = vsub.f32 %v654_v27, %v658_v37  ;;  %v660_v49 = vsel %vm321_vm0, %v658_v37, %v659_v39  ;;  %v307_v17 = vadd.f32 %v304_v5, %v245_v23 }
  0xed   : > { %v698_v43 = vrot.slane %v694_v35, 6  ;;  %v664_v59 = vsub.f32 %v655_v29, %v660_v49  ;;  %952 = vrsqrt.f32 %v1397_v0  ;;  %v1411_v18 = vadd.f32 1e-06, %v468_v3 }
  0xee   : > { %v697_v40 = vrot.slane %v693_v31, 6  ;;  %v665_v55 = vmul.f32 %v663_v45, %v663_v45  ;;  %v314_v20 = vsel %vm311_vm1, %v312_v6, %v313_v2  ;;  %v376_v21 = vrot.slane %v1377_v19, 2 }
  0xef   : > { %583 = vrot.lane.b32.xlu1 %v1327_v32, %s1121_s4  ;;  %v666_v8 = vmul.f32 %v664_v59, %v664_v59  ;;  %v368_v24 = vsel %vm301_vm2, %v366_v10, %v367_v9  ;;  %v375_v27 = vrot.slane %v1385_v26, 2  ;;  %v372_v23 = vadd.f32 %v367_v9, %v1377_v19 }
  0xf0   : > { %581 = vrot.lane.b32.xlu0 %v1324_v30, %s1121_s4  ;;  %v702_v50 = vsub.f32 %v693_v31, %v697_v40  ;;  %v699_v53 = vsel %vm321_vm0, %v697_v40, %v698_v43  ;;  %v1400_v4 = vadd.f32 1e-06, %v665_v55  ;;  %v318_v28 = vadd.f32 %v313_v2, %v308_v15  ;;  %s1544_s4 = scalar_lea.hbm %s1590_s2, %s876_s14 }
  0xf1   : > { %v703_v62 = vsub.f32 %v694_v35, %v699_v53  ;;  %v1416_v22 = vadd.f32 1e-06, %v666_v8  ;;  %v317_v29 = vadd.f32 %v314_v20, %v307_v17  ;;  %v371_v31 = vadd.f32 %v368_v24, %v1385_v26 }
  0xf2   : > { %v704_v63 = vmul.f32 %v702_v50, %v702_v50  ;;  %954 = vrsqrt.f32 %v1400_v4  ;;  %v377_v33 = vsel %vm311_vm1, %v375_v27, %v376_v21  ;;  %v381_v34 = vadd.f32 %v376_v21, %v372_v23 }
  0xf3   : > { %v705_v11 = vmul.f32 %v703_v62, %v703_v62  ;;  %956 = vrsqrt.f32 %v1403_v7  ;;  %v330_v35 = vmul.f32 %v318_v28, %v318_v28  ;;  %v329_v37 = vmul.f32 %v317_v29, %v317_v29 }
  0xf4   : > { %v1405_v12 = vadd.f32 1e-06, %v704_v63  ;;  %v380_v38 = vadd.f32 %v377_v33, %v371_v31  ;;  %v392_v43 = vmul.f32 %v381_v34, %v381_v34  ;;  %vm505_vm3 = vcmp.eq.f32.partialorder %v1397_v0, inf }
  0xf5   : > { %v1421_v14 = vadd.f32 1e-06, %v705_v11  ;;  %vm507_vm4 = vcmp.eq.f32.partialorder %v1397_v0, 0.0  ;;  %v508_v45 = vand.u32 2147483648, %v1397_v0  ;;  %vm519_vm5 = vcmp.eq.f32.partialorder %v1403_v7, inf }
  0xf6   : > { %958 = vrsqrt.f32 %v1405_v12  ;;  %vm521_vm6 = vcmp.eq.f32.partialorder %v1403_v7, 0.0  ;;  %v391_v49 = vmul.f32 %v380_v38, %v380_v38  ;;  %v522_v50 = vand.u32 2147483648, %v1403_v7 }
  0xf7   : > { %960 = vrsqrt.f32 %v1407_v13  ;;  %v953_v19 = vpop.eup %952  ;;  %vm459_vm7 = vcmp.eq.f32.partialorder %v1407_v13, inf  ;;  %v462_v54 = vand.u32 2147483648, %v1407_v13  ;;  %vm473_vm8 = vcmp.eq.f32.partialorder %v1411_v18, inf }
  0xf8   : > { %962 = vrsqrt.f32 %v1411_v18  ;;  %v504_v57 = vmul.f32 %v953_v19, %v1397_v0  ;;  %vm461_vm9 = vcmp.eq.f32.partialorder %v1407_v13, 0.0  ;;  %vm475_vm10 = vcmp.eq.f32.partialorder %v1411_v18, 0.0 }
  0xf9   : > { %964 = vrsqrt.f32 %v1416_v22  ;;  %vm673_vm11 = vcmp.eq.f32.partialorder %v1400_v4, inf  ;;  %v476_v1 = vand.u32 2147483648, %v1411_v18  ;;  %vm675_vm12 = vcmp.eq.f32.partialorder %v1400_v4, 0.0 }
  0xfa   : > { %966 = vrsqrt.f32 %v1421_v14  ;;  %v676_v3 = vand.u32 2147483648, %v1400_v4  ;;  %vm712_vm13 = vcmp.eq.f32.partialorder %v1405_v12, inf  ;;  %v715_v5 = vand.u32 2147483648, %v1405_v12 }
  0xfb   : > { %v506_v6 = vsel %vm505_vm3, %v1397_v0, %v504_v57  ;;  %vm680_vm14 = vcmp.eq.f32.partialorder %v1416_v22, inf  ;;  %vm719_vm15 = vcmp.eq.f32.partialorder %v1421_v14, inf  ;;  %vm714_vm2 = vcmp.eq.f32.partialorder %v1405_v12, 0.0 }
  0xfc   : > { %v955_v41 = vpop.eup %954  ;;  %vm682_vm3 = vcmp.eq.f32.partialorder %v1416_v22, 0.0  ;;  %v683_v21 = vand.u32 2147483648, %v1416_v22  ;;  %v722_v24 = vand.u32 2147483648, %v1421_v14  ;;  %v509_v27 = vsel %vm507_vm4, %v508_v45, %v506_v6 }
  0xfd   : > { %v957_v26 = vpop.eup %956  ;;  %v672_v58 = vmul.f32 %v955_v41, %v1400_v4 }
  0xfe   : > { %v518_v61 = vmul.f32 %v957_v26, %v1403_v7 }
  0xff   : > { %v674_v9 = vsel %vm673_vm11, %v1400_v4, %v672_v58 }
 0x100   : > { %v959_v46 = vpop.eup %958  ;;  %v520_v10 = vsel %vm519_vm5, %v1403_v7, %v518_v61  ;;  %vm721_vm5 = vcmp.eq.f32.partialorder %v1421_v14, 0.0 }
 0x101   : > { %v961_v51 = vpop.eup %960  ;;  %v711_v2 = vmul.f32 %v959_v46, %v1405_v12  ;;  %v523_v23 = vsel %vm521_vm6, %v522_v50, %v520_v10 }
 0x102   : > { %v963_v55 = vpop.eup %962  ;;  %v458_v8 = vmul.f32 %v961_v51, %v1407_v13 }
 0x103   : > { %v965_v59 = vpop.eup %964  ;;  %v472_v11 = vmul.f32 %v963_v55, %v1411_v18  ;;  %v713_v20 = vsel %vm712_vm13, %v1405_v12, %v711_v2  ;;  %v677_v12 = vsel %vm675_vm12, %v676_v3, %v674_v9 }
 0x104   : > { %v967_v62 = vpop.eup %966  ;;  %v679_v15 = vmul.f32 %v965_v59, %v1416_v22  ;;  %v460_v28 = vsel %vm459_vm7, %v1407_v13, %v458_v8  ;;  %v716_v34 = vsel %vm714_vm2, %v715_v5, %v713_v20 }
 0x105   : > { %v718_v17 = vmul.f32 %v967_v62, %v1421_v14  ;;  %v474_v31 = vsel %vm473_vm8, %v1411_v18, %v472_v11  ;;  %v463_v4 = vsel %vm461_vm9, %v462_v54, %v460_v28 }
 0x106   : > { %v681_v33 = vsel %vm680_vm14, %v1416_v22, %v679_v15  ;;  %v477_v38 = vsel %vm475_vm10, %v476_v1, %v474_v31 }
 0x107   : > { %v720_v0 = vsel %vm719_vm15, %v1421_v14, %v718_v17  ;;  %v684_v19 = vsel %vm682_vm3, %v683_v21, %v681_v33  ;;  %v478_v59 = vsub.f32 %v463_v4, %v477_v38 }
 0x109   : > { %v479_v62 = vand.u32 2147483647, %v478_v59 }
 0x155   : > { %v341_v36 = vpop.permute.xlu1 %340 }
 0x156   : > { %v345_v39 = vadd.f32 %v341_v36, %v330_v35  ;;  %v339_v40 = vpop.permute.xlu0 %338 }
 0x157   : > { %v344_v42 = vadd.f32 %v339_v40, %v329_v37  ;;  %v524_v37 = vsub.f32 %v509_v27, %v523_v23  ;;  %v724_v40 = vsub.f32 %v677_v12, %v716_v34 }
 0x158   : > { %v1432_v44 = vadd.f32 1e-06, %v345_v39  ;;  %v723_v39 = vsel %vm721_vm5, %v722_v24, %v720_v0 }
 0x159   : > { %v1438_v47 = vadd.f32 1e-06, %v344_v42  ;;  %v403_v48 = vpop.permute.xlu1 %402  ;;  %v725_v54 = vsub.f32 %v684_v19, %v723_v39  ;;  %v525_v57 = vand.u32 2147483647, %v524_v37  ;;  %v726_v61 = vand.u32 2147483647, %v724_v40 }
 0x15a   : > { %968 = vrsqrt.f32 %v1432_v44  ;;  %v407_v52 = vadd.f32 %v403_v48, %v392_v43  ;;  %v401_v53 = vpop.permute.xlu0 %400  ;;  %vm357_vm4 = vcmp.eq.f32.partialorder %v1432_v44, inf  ;;  %vm359_vm6 = vcmp.eq.f32.partialorder %v1432_v44, 0.0 }
 0x15b   : > { %970 = vrsqrt.f32 %v1438_v47  ;;  %v406_v56 = vadd.f32 %v401_v53, %v391_v49  ;;  %v360_v42 = vand.u32 2147483648, %v1432_v44  ;;  %vm350_vm7 = vcmp.eq.f32.partialorder %v1438_v47, inf }
 0x15c   : > { %v1449_v60 = vadd.f32 1e-06, %v407_v52  ;;  %vm352_vm8 = vcmp.eq.f32.partialorder %v1438_v47, 0.0  ;;  %v353_v22 = vand.u32 2147483648, %v1438_v47  ;;  %v730_v1 = vrot.slane %v726_v61, 2 }
 0x15d   : > { %v1454_v63 = vadd.f32 1e-06, %v406_v56  ;;  %v545_v3 = vpop.permute.xlu1 %544 }
 0x15e   : > { %972 = vrsqrt.f32 %v1449_v60  ;;  %vm419_vm9 = vcmp.eq.f32.partialorder %v1449_v60, inf  ;;  %v422_v14 = vand.u32 2147483648, %v1449_v60  ;;  %vm421_vm10 = vcmp.eq.f32.partialorder %v1449_v60, 0.0  ;;  %v543_v5 = vpop.permute.xlu0 %542 }
 0x15f   : > { %974 = vrsqrt.f32 %v1454_v63  ;;  %vm412_vm11 = vcmp.eq.f32.partialorder %v1454_v63, inf  ;;  %v415_v48 = vand.u32 2147483648, %v1454_v63  ;;  %vm414_vm12 = vcmp.eq.f32.partialorder %v1454_v63, 0.0 }
 0x160   : > { %v549_v9 = vadd.f32 %v545_v3, %v1313_v16  ;;  %v548_v10 = vadd.f32 %v543_v5, %v1319_v25 }
 0x161   : > { %v584_v6 = vpop.permute.xlu1 %583 }
 0x162   : > { %v582_v8 = vpop.permute.xlu0 %581  ;;  %v588_v11 = vadd.f32 %v584_v6, %v1327_v32  ;;  %v551_v17 = vmul.f32 2.0, %v549_v9  ;;  %v550_v20 = vmul.f32 2.0, %v548_v10 }
 0x163   : > { %v587_v15 = vadd.f32 %v582_v8, %v1324_v30 }
 0x164   : > { %v969_v29 = vpop.eup %968  ;;  %v590_v21 = vmul.f32 2.0, %v588_v11  ;;  %v555_v27 = vrot.slane %v551_v17, 6  ;;  %v554_v23 = vrot.slane %v550_v20, 6 }
 0x165   : > { %v971_v35 = vpop.eup %970  ;;  %v356_v7 = vmul.f32 %v969_v29, %v1432_v44  ;;  %v589_v24 = vmul.f32 2.0, %v587_v15 }
 0x166   : > { %v349_v36 = vmul.f32 %v971_v35, %v1438_v47  ;;  %v594_v28 = vrot.slane %v590_v21, 6  ;;  %v556_v29 = vsel %vm321_vm0, %v554_v23, %v555_v27  ;;  %v559_v31 = vsub.f32 %v550_v20, %v554_v23 }
 0x167   : > { %v358_v18 = vsel %vm357_vm4, %v1432_v44, %v356_v7  ;;  %v527_v44 = vrot.slane %v525_v57, 7  ;;  %v593_v12 = vrot.slane %v589_v24, 6  ;;  %v560_v16 = vsub.f32 %v551_v17, %v556_v29 }
 0x168   : > { %v973_v41 = vpop.eup %972  ;;  %v351_v26 = vsel %vm350_vm7, %v1438_v47, %v349_v36  ;;  %v361_v49 = vsel %vm359_vm6, %v360_v42, %v358_v18  ;;  %v561_v34 = vmul.f32 %v559_v31, %v559_v31  ;;  %vm438_vm6 = vcmask 111616  }
 0x169   : > { %v975_v13 = vpop.eup %974  ;;  %v418_v43 = vmul.f32 %v973_v41, %v1449_v60  ;;  %v354_v47 = vsel %vm352_vm8, %v353_v22, %v351_v26  ;;  %v595_v33 = vsel %vm321_vm0, %v593_v12, %v594_v28  ;;  %v598_v0 = vsub.f32 %v589_v24, %v593_v12 }
 0x16a   : > { %v411_v45 = vmul.f32 %v975_v13, %v1454_v63  ;;  %v599_v25 = vsub.f32 %v590_v21, %v595_v33  ;;  %v562_v32 = vmul.f32 %v560_v16, %v560_v16  ;;  %v565_v7 = vadd.f32 1e-06, %v561_v34 }
 0x16b   : > { %v420_v46 = vsel %vm419_vm9, %v1449_v60, %v418_v43  ;;  %v727_v60 = vand.u32 2147483647, %v725_v54  ;;  %v600_v35 = vmul.f32 %v598_v0, %v598_v0  ;;  %vm436_vm7 = vcmask 113664  }
 0x16c   : > { %v423_v50 = vsel %vm421_vm10, %v422_v14, %v420_v46  ;;  %v413_v51 = vsel %vm412_vm11, %v1454_v63, %v411_v45  ;;  %v601_v30 = vmul.f32 %v599_v25, %v599_v25  ;;  %v566_v36 = vadd.f32 1e-06, %v562_v32 }
 0x16d   : > { %v425_v52 = vsub.f32 %v361_v49, %v423_v50  ;;  %v416_v53 = vsel %vm414_vm12, %v415_v48, %v413_v51  ;;  %v731_v63 = vrot.slane %v727_v60, 2  ;;  %v604_v37 = vadd.f32 1e-06, %v600_v35 }
 0x16e   : > { %v424_v55 = vsub.f32 %v354_v47, %v416_v53  ;;  %v605_v4 = vadd.f32 1e-06, %v601_v30  ;;  %976 = vrsqrt.f32 %v565_v7  ;;  %vm569_vm0 = vcmp.eq.f32.partialorder %v565_v7, inf }
 0x16f   : > { %v427_v56 = vand.u32 2147483647, %v425_v52  ;;  %v732_v2 = vsel %vm311_vm1, %v730_v1, %v731_v63  ;;  %978 = vrsqrt.f32 %v566_v36  ;;  %vm576_vm13 = vcmp.eq.f32.partialorder %v566_v36, inf }
 0x170   : > { %v426_v58 = vand.u32 2147483647, %v424_v55  ;;  %980 = vrsqrt.f32 %v604_v37  ;;  %vm608_vm14 = vcmp.eq.f32.partialorder %v604_v37, inf  ;;  %vm615_vm15 = vcmp.eq.f32.partialorder %v605_v4, inf }
 0x171   : > { %432 = vrot.lane.b32.xlu1 %v427_v56, %s1120_s19  ;;  %982 = vrsqrt.f32 %v605_v4  ;;  %vm571_vm2 = vcmp.eq.f32.partialorder %v565_v7, 0.0  ;;  %v572_v43 = vand.u32 2147483648, %v565_v7  ;;  %vm578_vm3 = vcmp.eq.f32.partialorder %v566_v36, 0.0 }
 0x172   : > { %430 = vrot.lane.b32.xlu0 %v426_v58, %s1120_s19  ;;  %v579_v22 = vand.u32 2147483648, %v566_v36  ;;  %vm610_vm5 = vcmp.eq.f32.partialorder %v604_v37, 0.0  ;;  %v611_v14 = vand.u32 2147483648, %v604_v37  ;;  %vm617_vm4 = vcmp.eq.f32.partialorder %v605_v4, 0.0 }
 0x173   : > { %v618_v26 = vand.u32 2147483648, %v605_v4  ;;  %vm484_vm8 = vcmask 106496   ;;  %vm633_vm9 = vcmask 5120   ;;  %vm631_vm10 = vcmask 7168  }
 0x175   : > { %528 = vrot.lane.b32.xlu1 %v527_v44, %s1120_s19 }
 0x176   : > { %481 = vrot.lane.b32.xlu0 %v479_v62, %s1120_s19 }
 0x178   : > { %v977_v38 = vpop.eup %976 }
 0x179   : > { %735 = vrot.lane.b32.xlu1 %v731_v63, %s1124_s16  ;;  %v979_v19 = vpop.eup %978  ;;  %v568_v41 = vmul.f32 %v977_v38, %v565_v7 }
 0x17a   : > { %733 = vrot.lane.b32.xlu0 %v732_v2, %s1124_s16  ;;  %v981_v39 = vpop.eup %980  ;;  %v575_v42 = vmul.f32 %v979_v19, %v566_v36  ;;  %s1048_s16 = sshll.u32 %s1125_s8, 4  ;;  %s1049_s16 = int_to_ptr.vmem [resolvable:$false] %s1048_s16 }
 0x17b   : > { %v983_v40 = vpop.eup %982  ;;  %v607_v13 = vmul.f32 %v981_v39, %v604_v37  ;;  %v570_v45 = vsel %vm569_vm0, %v565_v7, %v568_v41  ;;  %p1051_p5 = scmp.lt.s32.totalorder %s1546_s28, %s1049_s16 }
 0x17c   : > { %v614_v18 = vmul.f32 %v983_v40, %v605_v4  ;;  %v577_v46 = vsel %vm576_vm13, %v566_v36, %v575_v42  ;;  %v573_v50 = vsel %vm571_vm2, %v572_v43, %v570_v45 }
 0x17d   : > { %v609_v48 = vsel %vm608_vm14, %v604_v37, %v607_v13  ;;  %v580_v51 = vsel %vm578_vm3, %v579_v22, %v577_v46 }
 0x17e   : > { %v616_v49 = vsel %vm615_vm15, %v605_v4, %v614_v18  ;;  %v612_v52 = vsel %vm610_vm5, %v611_v14, %v609_v48 }
 0x17f   : > { %v619_v47 = vsel %vm617_vm4, %v618_v26, %v616_v49  ;;  %v620_v53 = vsub.f32 %v573_v50, %v612_v52  ;;  %v752_v49 = vlaneseq }
 0x180   : > { %v621_v54 = vsub.f32 %v580_v51, %v619_v47 }
 0x181   : > { %v622_v55 = vand.u32 2147483647, %v620_v53  ;;  %v753_v50 = vand.u32 127, %v752_v49 }
 0x182   : > { %v623_v56 = vand.u32 2147483647, %v621_v54 }
 0x183   : > { %v626_v59 = vrot.slane %v622_v55, 2 }
 0x184   : > { %v627_v60 = vrot.slane %v623_v56, 2 }
 0x186   : > { %v628_v3 = vsel %vm311_vm1, %v626_v59, %v627_v60  ;;  %v634_v11 = vsel %vm633_vm9, %v627_v60, 0.0  ;;  %vm754_vm1 = vcmp.eq.s32.totalorder %v753_v50, 0 }
 0x187   : > { %v632_v10 = vsel %vm631_vm10, %v628_v3, 0.0 }
 0x188   : > { %v635_v20 = vadd.f32 %v634_v11, %v632_v10 }
 0x1e3   : > { %v433_v57 = vpop.permute.xlu1 %432 }
 0x1e4   : > { %v431_v58 = vpop.permute.xlu0 %430  ;;  %v439_v44 = vsel %vm438_vm6, %v433_v57, 0.0 }
 0x1e5   : > { %v437_v62 = vsel %vm436_vm7, %v431_v58, 0.0 }
 0x1e6   : > { %v440_v6 = vadd.f32 %v439_v44, %v437_v62 }
 0x1e7   : > { %v529_v61 = vpop.permute.xlu1 %528 }
 0x1e8   : > { %v482_v63 = vpop.permute.xlu0 %481  ;;  %v531_v1 = vsel %vm484_vm8, %v529_v61, 0.0 }
 0x1e9   : > { %532 = vadd.xlane.f32.xlu0 %v531_v1  ;;  %v485_v2 = vsel %vm484_vm8, %v482_v63, 0.0 }
 0x1ea   : > { %486 = vadd.xlane.f32.xlu1 %v485_v2 }
 0x1eb   : > { %v736_v5 = vpop.permute.xlu1 %735 }
 0x1ec   : > { %v740_v8 = vsel %vm633_vm9, %v736_v5, 0.0  ;;  %v734_v9 = vpop.permute.xlu0 %733 }
 0x1ed   : > { %v739_v15 = vsel %vm631_vm10, %v734_v9, 0.0  ;;  %441 = vadd.xlane.f32.xlu0 %v440_v6 }
 0x1ee   : > { %v741_v17 = vadd.f32 %v740_v8, %v739_v15 }
 0x1f0   : > { %742 = vadd.xlane.f32.xlu1 %v741_v17 }
 0x1f1   : > { %636 = vadd.xlane.f32.xlu0 %v635_v20 }
 0x276   : > { %v533_v21 = vpop.xlane.xlu0 %532 }
 0x277   : > { %v534_v24 = vrot.slane %v533_v21, 4  ;;  %v487_v27 = vpop.xlane.xlu1 %486 }
 0x278   : > { %v488_v23 = vrot.slane %v487_v27, 4 }
 0x279   : > { %v535_v28 = vadd.f32 %v534_v24, %v533_v21 }
 0x27a   : > { %v489_v12 = vadd.f32 %v488_v23, %v487_v27  ;;  %v442_v29 = vpop.xlane.xlu0 %441 }
 0x27b   : > { %v536_v31 = vrot.slane %v535_v28, 2  ;;  %v443_v33 = vrot.slane %v442_v29, 4 }
 0x27c   : > { %v490_v16 = vrot.slane %v489_v12, 2 }
 0x27d   : > { %v444_v0 = vadd.f32 %v443_v33, %v442_v29  ;;  %v743_v25 = vpop.xlane.xlu1 %742  ;;  %v537_v36 = vadd.f32 %v536_v31, %v535_v28 }
 0x27e   : > { %v744_v34 = vrot.slane %v743_v25, 4  ;;  %v637_v32 = vpop.xlane.xlu0 %636  ;;  %v491_v35 = vadd.f32 %v490_v16, %v489_v12 }
 0x27f   : > { %v445_v30 = vrot.slane %v444_v0, 2  ;;  %v638_v7 = vrot.slane %v637_v32, 4  ;;  %v538_v42 = vrot.slane %v537_v36, 1 }
 0x280   : > { %v745_v37 = vadd.f32 %v744_v34, %v743_v25  ;;  %v492_v39 = vrot.slane %v491_v35, 1 }
 0x281   : > { %v639_v4 = vadd.f32 %v638_v7, %v637_v32  ;;  %v446_v38 = vadd.f32 %v445_v30, %v444_v0  ;;  %v539_v26 = vadd.f32 %v538_v42, %v537_v36 }
 0x282   : > { %v746_v19 = vrot.slane %v745_v37, 2  ;;  %v493_v22 = vadd.f32 %v492_v39, %v491_v35 }
 0x283   : > { %v640_v40 = vrot.slane %v639_v4, 2  ;;  %v447_v41 = vrot.slane %v446_v38, 1 }
 0x284   : > { %v747_v13 = vadd.f32 %v746_v19, %v745_v37 }
 0x285   : > { %v641_v18 = vadd.f32 %v640_v40, %v639_v4  ;;  %v448_v43 = vadd.f32 %v447_v41, %v446_v38 }
 0x286   : > { %v748_v14 = vrot.slane %v747_v13, 1 }
 0x287   : > { %884 = vpush %v448_v43  ;;  %v642_v45 = vrot.slane %v641_v18, 1 }
 0x288   : > { %886 = vpush %v493_v22  ;;  %v749_v46 = vadd.f32 %v748_v14, %v747_v13 }
 0x289   : > { %888 = vpush %v539_v26  ;;  %v643_v48 = vadd.f32 %v642_v45, %v641_v18 }
 0x28b   : > { %890 = vpush %v643_v48 }
 0x28c   : > { %892 = vpush %v749_v46 }
 0x2b8   : > { %s885_s27 = spop %884 }
 0x2b9   : > { %s887_s23 = spop %886 }
 0x2ba   : > { %s495_s25 = sadd.f32 %s887_s23, %s885_s27  ;;  %s889_s26 = spop %888 }
 0x2bb   : > { %s1050_s27 = scalar_lea.vmem %s1049_s16, 32 }
 0x2bc   : > { %s541_s24 = sadd.f32 %s889_s26, %s495_s25  ;;  %s891_s6 = spop %890 }
 0x2bd   : > { %s893_s3 = spop %892  ;;  %p1052_p7 = scmp.lt.s32.totalorder %s1050_s27, %s1044_s13 }
 0x2be   : > { %s645_s7 = sadd.f32 %s891_s6, %s541_s24 }
 0x2bf   : > { %p1053_p9 = por %p1052_p7, %p1051_p5 }
 0x2c0   : > { %s751_s22 = sadd.f32 %s893_s3, %s645_s7 }
 0x2c1   : > { %p1054_p11 = pnand %p1053_p9, %p1047_p10 }
 0x2c2   : > { %v755_v51 = vstv %s751_s22 }
 0x2c3   : > { %v756_v52 = vsel %vm754_vm1, %v755_v51, 0.0 }
 0x2c4   : > { %757 = vst [vmem:[%s200_s17] sm:$0x1] %v756_v52 }
 0x2c5   : > { %1057 = shalt.err (!%p1054_p11)
}
 0x2c6   : > { %s1058_s30 = scalar_lea.hbm %s1544_s4, 16  ;;  %s1062_s26 = scalar_lea.hbm %s1590_s2, 32 }
 0x2c7   : > { %p1059_p3 = scmp.ne.s32.totalorder %s1544_s4, %s1058_s30  ;;  %p1063_p2 = scmp.lt.u32.totalorder %s1544_s4, %s1590_s2 }
 0x2c8   : > { %p1064_p4 = scmp.lt.u32.totalorder %s1062_s26, %s1058_s30  ;;  %p1066_p13 = scmp.lt.u32.totalorder %s1058_s30, %s1544_s4 }
 0x2c9   : > { %p1060_p8 = pnand %p1059_p3, %p1599_p1 }
 0x2ca   : > { %p1065_p6 = por %p1064_p4, %p1063_p2 }
 0x2cb   : > { %p1061_p0 = pneg %p1060_p8 }
 0x2cc   : > { %p1067_p12 = por %p1066_p13, %p1065_p6 }
 0x2ce   : > { %p1068_p10 = pnand %p1067_p12, %p1061_p0 }
 0x2d0   : > { %1071 = shalt.err (!%p1068_p10)
}
 0x2d1   : > { %898 = dma.vmem_to_hbm [thread:$0]  (%p1599_p1), %s1546_s28, 16, %s1544_s4, %s759_s5  }
 0x2d2 PF: > { %s783_s7 = sand.u32 1, %s1102_s9   ;;  %p1600_p5 = scmp.ne.s32.totalorder %s1595_s21, 0 }
 0x2d3   : > { %p1601_p7 = scmp.ge.s32.totalorder %s1114_s12, 2  ;;  %s784_s14 = scalar_lea.sflag [#allocation4], %s783_s7 }
 0x2d5   : > { %p908_p9 = pnand %p1601_p7, %p1600_p5 }
 0x2d7   : > { %1097 = dma.done.wait (!%p908_p9), %s784_s14, 16  }
 0x2d8   : > { %1099 = vsyncadd (!%p908_p9), %s784_s14, 4294967280  ;;  %p18_p11 = scmp.ge.s32.totalorder %s1166_s15, 4   ;;  %s1602_s9 = smov %s1106_s10 }
 0x2d9   : > { %s1603_s10 = smov %s1110_s11  ;;  %s1604_s11 = smov %s1178_s18 }
 0x2da   : > { %s1605_s12 = smov %s1166_s15  ;;  %20 = sbr.rel (!%p18_p11) target bundleno = 7 (0x7), region = 90 }
 0x2e1   :  { %788 = vsyncpa [#allocation3], 1 }
 0x2e2   :  { %790 = vsyncpa [#allocation3 + $0x1], 1 }
 0x2e3   :  { %791 = vsyncpa [#allocation6], 1 }
 0x2e4   :  { %793 = vsyncpa [#allocation6 + $0x1], 1 }
 0x2e5   :  { %794 = vsyncpa [#allocation4], 1 }
 0x2e6   :  { %796 = vsyncpa [#allocation4 + $0x1], 1 }

</bundles_post_ra>
